<compile_context>
chip_gen: v7x
topology: tpu7x:2x2x1
jax: 0.10.0
libtpu: 0.0.40
codegen_flags: <defaults>
</compile_context>

<pallas_src>
import functools

import jax
import jax.numpy as jnp
from jax.experimental import pallas as pl
from jax.experimental.pallas import tpu as pltpu


def _qwen2_mlp_kernel(x_ref, wg_ref, wu_ref, wd_ref, o_ref, acc_ref):
    # x_ref:  (tm, H)   sequence tile (resident across the intermediate axis)
    # wg_ref: (H, ti)   gate weight slab (transposed)
    # wu_ref: (H, ti)   up   weight slab (transposed)
    # wd_ref: (ti, H)   down weight slab (transposed)
    # o_ref:  (tm, H)   output tile (same block across intermediate axis)
    # acc_ref:(tm, H)   f32 accumulator scratch
    j = pl.program_id(1)

    @pl.when(j == 0)
    def _():
        acc_ref[...] = jnp.zeros_like(acc_ref)

    x = x_ref[...]
    gate = jnp.dot(x, wg_ref[...], preferred_element_type=jnp.float32)
    up = jnp.dot(x, wu_ref[...], preferred_element_type=jnp.float32)

    # SiluAndMul: silu(gate) * up, computed in f32 on a (tm, ti) slab only.
    act = (gate * jax.nn.sigmoid(gate)) * up

    # Partial down-projection, accumulated in f32; cast only on final writeback.
    acc_ref[...] += jnp.dot(act.astype(wd_ref.dtype), wd_ref[...],
                            preferred_element_type=jnp.float32)

    @pl.when(j == pl.num_programs(1) - 1)
    def _():
        o_ref[...] = acc_ref[...].astype(o_ref.dtype)


def prepare_qwen2_mlp_weights(w_gate_up, w_down):
    """One-time weight re-layout (do at weight-load time, NOT per forward call).

    w_gate_up: [2*I, H]  (PyTorch MergedColumnParallelLinear layout)
    w_down:    [H, I]    (PyTorch RowParallelLinear layout)
    Returns (w_gate_t [H, I], w_up_t [H, I], w_down_t [I, H]).
    """
    two_I, _ = w_gate_up.shape
    I = two_I // 2
    w_gate_t = jnp.transpose(w_gate_up[:I, :])
    w_up_t = jnp.transpose(w_gate_up[I:, :])
    w_down_t = jnp.transpose(w_down)
    return w_gate_t, w_up_t, w_down_t


def _round_up(x, m):
    return (x + m - 1) // m * m


def _pick_ti(I, preferred):
    """Largest 128-aligned divisor of I that is <= preferred."""
    ti = min(preferred, I)
    ti = max(128, (ti // 128) * 128)
    while I % ti != 0:
        ti -= 128
    return ti


def qwen2_mlp(x, w_gate_t, w_up_t, w_down_t, *, tm=256, ti=512):
    """x: [S, H]; weights pre-laid-out by prepare_qwen2_mlp_weights."""
    S, H = x.shape
    H2, I = w_gate_t.shape
    assert H == H2
    assert w_up_t.shape == (H, I)
    assert w_down_t.shape == (I, H)
    assert I % 128 == 0, "intermediate_size must be a multiple of 128"

    ti = _pick_ti(I, ti)

    # Sequence tiling: clamp for small inputs, pad ragged last tile with zeros.
    tm = min(tm, _round_up(S, 8))
    tm = _round_up(tm, 8)
    S_pad = _round_up(S, tm)
    if S_pad != S:
        x = jnp.pad(x, ((0, S_pad - S), (0, 0)))

    grid = (S_pad // tm, I // ti)

    w_bytes = w_gate_t.dtype.itemsize
    x_bytes = x.dtype.itemsize
    # Rough per-step VMEM footprint (double-buffered streams + f32 accumulator).
    vmem_est = (2 * tm * H * x_bytes            # x tiles
                + 2 * 2 * H * ti * w_bytes      # gate + up weight slabs
                + 2 * ti * H * w_bytes          # down weight slabs
                + tm * H * 4                    # f32 accumulator
                + 2 * tm * H * x_bytes)         # output tiles
    vmem_limit = int(min(96 * 2**20, max(32 * 2**20, 2 * vmem_est)))

    cost = pl.CostEstimate(
        flops=6 * S_pad * H * I,                # 3 matmuls of S*H*I each
        transcendentals=S_pad * I,              # sigmoid
        bytes_accessed=(S_pad * H * x_bytes     # read x
                        + 3 * H * I * w_bytes   # read weights once
                        + S_pad * H * x_bytes), # write out
    )

    out = pl.pallas_call(
        _qwen2_mlp_kernel,
        out_shape=jax.ShapeDtypeStruct((S_pad, H), x.dtype),
        grid_spec=pltpu.PrefetchScalarGridSpec(
            num_scalar_prefetch=0,
            grid=grid,
            in_specs=[
                pl.BlockSpec((tm, H), lambda i, j: (i, 0)),   # x tile
                pl.BlockSpec((H, ti), lambda i, j: (0, j)),   # gate weight slab
                pl.BlockSpec((H, ti), lambda i, j: (0, j)),   # up weight slab
                pl.BlockSpec((ti, H), lambda i, j: (j, 0)),   # down weight slab
            ],
            out_specs=pl.BlockSpec((tm, H), lambda i, j: (i, 0)),
            scratch_shapes=[pltpu.VMEM((tm, H), jnp.float32)],
        ),
        compiler_params=pltpu.CompilerParams(
            dimension_semantics=("parallel", "arbitrary"),
            vmem_limit_bytes=vmem_limit,
        ),
        cost_estimate=cost,
    )(x, w_gate_t, w_up_t, w_down_t)

    return out[:S]


def qwen2_mlp_ref(x, w_gate_up, w_down):
    I = w_gate_up.shape[0] // 2
    gate_up = x @ w_gate_up.T
    gate, up = gate_up[:, :I], gate_up[:, I:]
    return (jax.nn.silu(gate) * up) @ w_down.T


if __name__ == "__main__":
    # Small Qwen2-like config.
    seq_len = 16
    hidden_size = 128
    intermediate_size = 256

    key = jax.random.PRNGKey(0)
    k_x, k_gu, k_d = jax.random.split(key, 3)

    x = jax.random.normal(k_x, (seq_len, hidden_size), dtype=jnp.float32)
    # PyTorch nn.Linear-style weight shapes: [out_features, in_features]
    w_gate_up = jax.random.normal(
        k_gu, (2 * intermediate_size, hidden_size), dtype=jnp.float32) * 0.02
    w_down = jax.random.normal(
        k_d, (hidden_size, intermediate_size), dtype=jnp.float32) * 0.02

    # One-time weight re-layout, hoisted out of the forward path.
    w_gate_t, w_up_t, w_down_t = jax.block_until_ready(
        prepare_qwen2_mlp_weights(w_gate_up, w_down))

    out = qwen2_mlp(x, w_gate_t, w_up_t, w_down_t)
    out = jax.block_until_ready(out)

    ref = qwen2_mlp_ref(x, w_gate_up, w_down)
    assert out.shape == (seq_len, hidden_size)
    assert jnp.allclose(out, ref, atol=1e-4, rtol=1e-4), "mismatch vs reference"

    print("KERNEL_OK")
</pallas_src>

<mosaic_0001>
module attributes {stable_mosaic.version = 11 : i64} {
  func.func @_qwen2_mlp_kernel(%arg0: i32, %arg1: i32, %arg2: memref<16x128xf32, #tpu.memory_space<vmem>>, %arg3: memref<128x256xf32, #tpu.memory_space<vmem>>, %arg4: memref<128x256xf32, #tpu.memory_space<vmem>>, %arg5: memref<256x128xf32, #tpu.memory_space<vmem>>, %arg6: memref<16x128xf32, #tpu.memory_space<vmem>>, %arg7: memref<16x128xf32, #tpu.memory_space<vmem>>) attributes {dimension_semantics = [#tpu.dimension_semantics<parallel>, #tpu.dimension_semantics<arbitrary>], iteration_bounds = array<i64: 1, 1>, scalar_prefetch = 0 : i64, scratch_operands = 1 : i64, tpu.core_type = #tpu.core_type<tc>, window_params = [{transform_indices = @transform_0, window_bounds = array<i64: 16, 128>}, {transform_indices = @transform_1, window_bounds = array<i64: 128, 256>}, {transform_indices = @transform_2, window_bounds = array<i64: 128, 256>}, {transform_indices = @transform_3, window_bounds = array<i64: 256, 128>}, {transform_indices = @transform_4, window_bounds = array<i64: 16, 128>}]} {
    %c0_i32 = arith.constant 0 : i32
    %0 = arith.cmpi eq, %arg1, %c0_i32 : i32
    %1 = arith.extui %0 : i1 to i32
    %c0_i32_0 = arith.constant 0 : i32
    %2 = arith.cmpi ne, %1, %c0_i32_0 : i32
    scf.if %2 {
      %cst_17 = arith.constant 0.000000e+00 : f32
      %23 = vector.broadcast %cst_17 : f32 to vector<16x128xf32>
      %c0_18 = arith.constant 0 : index
      %c0_19 = arith.constant 0 : index
      %24 = vector.load %arg7[%c0_18, %c0_19] : memref<16x128xf32, #tpu.memory_space<vmem>>, vector<16x128xf32>
      tpu.vector_store %arg7[%c0_18, %c0_19], %23 {strides = array<i32>} : memref<16x128xf32, #tpu.memory_space<vmem>>, vector<16x128xf32>,
    } else {
    }
    %c0 = arith.constant 0 : index
    %c0_1 = arith.constant 0 : index
    %3 = vector.load %arg2[%c0, %c0_1] : memref<16x128xf32, #tpu.memory_space<vmem>>, vector<16x128xf32>
    %c0_2 = arith.constant 0 : index
    %c0_3 = arith.constant 0 : index
    %4 = vector.load %arg3[%c0_2, %c0_3] : memref<128x256xf32, #tpu.memory_space<vmem>>, vector<128x256xf32>
    %cst = arith.constant dense<0.000000e+00> : vector<16x256xf32>
    %5 = tpu.matmul %3, %4, %cst {dimension_numbers = #tpu.dot_dimension_numbers<[1], [0], [0], [1], [0, 0, 1, 1], [], []>} : vector<16x128xf32>, vector<128x256xf32>, vector<16x256xf32> -> vector<16x256xf32>
    %c0_4 = arith.constant 0 : index
    %c0_5 = arith.constant 0 : index
    %6 = vector.load %arg4[%c0_4, %c0_5] : memref<128x256xf32, #tpu.memory_space<vmem>>, vector<128x256xf32>
    %cst_6 = arith.constant dense<0.000000e+00> : vector<16x256xf32>
    %7 = tpu.matmul %3, %6, %cst_6 {dimension_numbers = #tpu.dot_dimension_numbers<[1], [0], [0], [1], [0, 0, 1, 1], [], []>} : vector<16x128xf32>, vector<128x256xf32>, vector<16x256xf32> -> vector<16x256xf32>
    %8 = arith.negf %5 : vector<16x256xf32>
    %9 = math.exp %8 : vector<16x256xf32>
    %cst_7 = arith.constant 1.000000e+00 : f32
    %10 = vector.broadcast %cst_7 : f32 to vector<16x256xf32>
    %11 = arith.addf %10, %9 : vector<16x256xf32>
    %12 = arith.divf %10, %11 : vector<16x256xf32>
    %13 = arith.mulf %5, %12 : vector<16x256xf32>
    %14 = arith.mulf %13, %7 : vector<16x256xf32>
    %c0_8 = arith.constant 0 : index
    %c0_9 = arith.constant 0 : index
    %15 = vector.load %arg7[%c0_8, %c0_9] : memref<16x128xf32, #tpu.memory_space<vmem>>, vector<16x128xf32>
    %c0_10 = arith.constant 0 : index
    %c0_11 = arith.constant 0 : index
    %16 = vector.load %arg5[%c0_10, %c0_11] : memref<256x128xf32, #tpu.memory_space<vmem>>, vector<256x128xf32>
    %cst_12 = arith.constant dense<0.000000e+00> : vector<16x128xf32>
    %17 = tpu.matmul %14, %16, %cst_12 {dimension_numbers = #tpu.dot_dimension_numbers<[1], [0], [0], [1], [0, 0, 1, 1], [], []>} : vector<16x256xf32>, vector<256x128xf32>, vector<16x128xf32> -> vector<16x128xf32>
    %18 = arith.addf %15, %17 : vector<16x128xf32>
    %c0_13 = arith.constant 0 : index
    %c0_14 = arith.constant 0 : index
    %19 = vector.load %arg7[%c0_13, %c0_14] : memref<16x128xf32, #tpu.memory_space<vmem>>, vector<16x128xf32>
    tpu.vector_store %arg7[%c0_13, %c0_14], %18 {strides = array<i32>} : memref<16x128xf32, #tpu.memory_space<vmem>>, vector<16x128xf32>,
    %c0_i32_15 = arith.constant 0 : i32
    %20 = arith.cmpi eq, %arg1, %c0_i32_15 : i32
    %21 = arith.extui %20 : i1 to i32
    %c0_i32_16 = arith.constant 0 : i32
    %22 = arith.cmpi ne, %21, %c0_i32_16 : i32
    scf.if %22 {
      %c0_17 = arith.constant 0 : index
      %c0_18 = arith.constant 0 : index
      %23 = vector.load %arg7[%c0_17, %c0_18] : memref<16x128xf32, #tpu.memory_space<vmem>>, vector<16x128xf32>
      %c0_19 = arith.constant 0 : index
      %c0_20 = arith.constant 0 : index
      %24 = vector.load %arg6[%c0_19, %c0_20] : memref<16x128xf32, #tpu.memory_space<vmem>>, vector<16x128xf32>
      tpu.vector_store %arg6[%c0_19, %c0_20], %23 {strides = array<i32>} : memref<16x128xf32, #tpu.memory_space<vmem>>, vector<16x128xf32>,
    } else {
    }
    return
  }
  func.func @transform_0(%arg0: i32, %arg1: i32) -> (i32, i32) {
    %c0_i32 = arith.constant 0 : i32
    %c0_i32_0 = arith.constant 0 : i32
    return %arg0, %c0_i32 : i32, i32
  }
  func.func @transform_1(%arg0: i32, %arg1: i32) -> (i32, i32) {
    %c0_i32 = arith.constant 0 : i32
    %c0_i32_0 = arith.constant 0 : i32
    return %c0_i32, %arg1 : i32, i32
  }
  func.func @transform_2(%arg0: i32, %arg1: i32) -> (i32, i32) {
    %c0_i32 = arith.constant 0 : i32
    %c0_i32_0 = arith.constant 0 : i32
    return %c0_i32, %arg1 : i32, i32
  }
  func.func @transform_3(%arg0: i32, %arg1: i32) -> (i32, i32) {
    %c0_i32 = arith.constant 0 : i32
    %c0_i32_0 = arith.constant 0 : i32
    return %arg1, %c0_i32 : i32, i32
  }
  func.func @transform_4(%arg0: i32, %arg1: i32) -> (i32, i32) {
    %c0_i32 = arith.constant 0 : i32
    %c0_i32_0 = arith.constant 0 : i32
    return %arg0, %c0_i32 : i32, i32
  }
}

</mosaic_0001>

<bundles_post_ra>
// kernel: tpu_custom_call.1
= control target key start
LH: loop header
LB: loop body
LE: loop exit
PB: predicated region body
PF: predicated region fallthrough
CT: control target
= control target key end

     0   :  { %9 = vsyncpa [#allocation4], 0  ;;  %s889_s0 = inlined_call_operand.hbm [shape: f32[16,128], index: 0, kind: input, shape index: {}]   ;;  %s890_s1 = inlined_call_operand.hbm [shape: f32[128,256], index: 1, kind: input, shape index: {}]   ;;  %s891_s2 = inlined_call_operand.hbm [shape: f32[128,256], index: 2, kind: input, shape index: {}]   ;;  %s892_s3 = inlined_call_operand.hbm [shape: f32[256,128], index: 3, kind: input, shape index: {}]   ;;  %s893_s4 = inlined_call_operand.hbm [shape: f32[16,128], index: 4, kind: output, shape index: {}]  }
   0x1   :  { %10 = vsyncpa [#allocation7], 0 }
   0x2   :  { %11 = vsyncpa [#allocation10], 0 }
   0x3   :  { %12 = vsyncpa [#allocation5], 0  ;;  %s768_s15 = smov [#allocation6]   ;;  %s650_s19 = scalar_lea.hbm %s890_s1, 4096 }
   0x4   :  { %s30_s16 = sshll.u32 %s768_s15, 4  ;;  %p651_p0 = scmp.ne.s32.totalorder %s890_s1, %s650_s19  ;;  %s31_s16 = int_to_ptr.vmem [resolvable:$true] %s30_s16 }
   0x5   :  { %p654_p1 = scmp.lt.u32.totalorder %s650_s19, %s890_s1 }
   0x7   :  { %p656_p2 = pnand %p654_p1, %p651_p0 }
   0x9   :  { %659 = shalt.err (!%p656_p2)
}
   0xa   :  { %s660_s24 = scalar_lea.vmem %s31_s16, 4096  ;;  %p665_p4 = scmp.lt.s32.totalorder %s31_s16, %s31_s16 }
   0xb   :  { %p661_p3 = scmp.ne.s32.totalorder %s31_s16, %s660_s24  ;;  %p666_p5 = scmp.lt.s32.totalorder %s660_s24, %s660_s24 }
   0xd   :  { %p667_p6 = por %p666_p5, %p665_p4 }
   0xf   :  { %p668_p7 = pnand %p667_p6, %p661_p3 }
  0x11   :  { %671 = shalt.err (!%p668_p7)
}
  0x12   :  { %s769_s25 = smov 256   ;;  %s770_s26 = smov 16  }
  0x13   :  { %36 = dma.hbm_to_vmem [thread:$0]  %s890_s1, 4096, %s31_s16, [#allocation7], %s769_s25, %s769_s25, %s770_s26  }
  0x14   :  { %s771_s29 = smov [#allocation3]   ;;  %s672_s7 = scalar_lea.hbm %s889_s0, 256 }
  0x15   :  { %s18_s30 = sshll.u32 %s771_s29, 4  ;;  %p673_p8 = scmp.ne.s32.totalorder %s889_s0, %s672_s7  ;;  %s19_s30 = int_to_ptr.vmem [resolvable:$true] %s18_s30 }
  0x16   :  { %p676_p9 = scmp.lt.u32.totalorder %s672_s7, %s889_s0 }
  0x18   :  { %p678_p10 = pnand %p676_p9, %p673_p8 }
  0x1a   :  { %681 = shalt.err (!%p678_p10)
}
  0x1b   :  { %s682_s12 = scalar_lea.vmem %s19_s30, 256  ;;  %p687_p12 = scmp.lt.s32.totalorder %s19_s30, %s19_s30 }
  0x1c   :  { %p683_p11 = scmp.ne.s32.totalorder %s19_s30, %s682_s12  ;;  %p688_p13 = scmp.lt.s32.totalorder %s682_s12, %s682_s12 }
  0x1e   :  { %p689_p0 = por %p688_p13, %p687_p12 }
  0x20   :  { %p690_p1 = pnand %p689_p0, %p683_p11 }
  0x22   :  { %693 = shalt.err (!%p690_p1)
}
  0x23   :  { %s772_s1 = smov 128   ;;  %s773_s13 = smov 8  }
  0x24   :  { %24 = dma.hbm_to_vmem [thread:$0]  %s889_s0, 256, %s19_s30, [#allocation4], %s772_s1, %s772_s1, %s773_s13  }
  0x25   :  { %s774_s16 = smov [#allocation8]   ;;  %s775_s18 = smov [#allocation9]  }
  0x26   :  { %s42_s17 = sshll.u32 %s774_s16, 4  ;;  %s54_s19 = sshll.u32 %s775_s18, 4  ;;  %s43_s17 = int_to_ptr.vmem [resolvable:$true] %s42_s17  ;;  %s833_s19 = int_to_ptr.vmem [resolvable:$true] %s54_s19 }
  0x27   :  { %s694_s22 = scalar_lea.hbm %s891_s2, 4096 }
  0x28   :  { %p695_p2 = scmp.ne.s32.totalorder %s891_s2, %s694_s22  ;;  %p698_p3 = scmp.lt.u32.totalorder %s694_s22, %s891_s2 }
  0x2a   :  { %p700_p4 = pnand %p698_p3, %p695_p2 }
  0x2c   :  { %703 = shalt.err (!%p700_p4)
}
  0x2d   :  { %s704_s0 = scalar_lea.vmem %s43_s17, 4096  ;;  %p709_p6 = scmp.lt.s32.totalorder %s43_s17, %s43_s17 }
  0x2e   :  { %p705_p5 = scmp.ne.s32.totalorder %s43_s17, %s704_s0  ;;  %p710_p7 = scmp.lt.s32.totalorder %s704_s0, %s704_s0 }
  0x30   :  { %p711_p8 = por %p710_p7, %p709_p6 }
  0x32   :  { %p712_p9 = pnand %p711_p8, %p705_p5 }
  0x34   :  { %715 = shalt.err (!%p712_p9)
}
  0x35   :  { %48 = dma.hbm_to_vmem [thread:$0]  %s891_s2, 4096, %s43_s17, [#allocation7], %s769_s25, %s769_s25, %s770_s26  }
  0x36   :  { %s716_s7 = scalar_lea.hbm %s892_s3, 4096 }
  0x37   :  { %p717_p10 = scmp.ne.s32.totalorder %s892_s3, %s716_s7  ;;  %p720_p11 = scmp.lt.u32.totalorder %s716_s7, %s892_s3 }
  0x39   :  { %p722_p12 = pnand %p720_p11, %p717_p10 }
  0x3b   :  { %725 = shalt.err (!%p722_p12)
}
  0x3c   :  { %s726_s12 = scalar_lea.vmem %s833_s19, 4096  ;;  %p731_p0 = scmp.lt.s32.totalorder %s833_s19, %s833_s19 }
  0x3d   :  { %p727_p13 = scmp.ne.s32.totalorder %s833_s19, %s726_s12  ;;  %p732_p1 = scmp.lt.s32.totalorder %s726_s12, %s726_s12 }
  0x3f   :  { %p733_p2 = por %p732_p1, %p731_p0 }
  0x41   :  { %p734_p3 = pnand %p733_p2, %p727_p13 }
  0x43   :  { %737 = shalt.err (!%p734_p3)
}
  0x44   :  { %60 = dma.hbm_to_vmem [thread:$0]  %s892_s3, 4096, %s833_s19, [#allocation10], %s772_s1, %s772_s1, %s773_s13  }
  0x45   :  { %760 = dma.done.wait [#allocation4], 256  }
  0x46   :  { %761 = vsyncadd [#allocation4], 4294967040 }
  0x47   :  { %762 = dma.done.wait [#allocation7], 8192  }
  0x48   :  { %763 = vsyncadd [#allocation7], 4294959104 }
  0x49   :  { %764 = dma.done.wait [#allocation10], 4096  }
  0x4a   :  { %765 = vsyncadd [#allocation10], 4294963200  ;;  %v776_v0 = vmov 0.0   ;;  %v82_v1 = vld [vmem:[#allocation6 + $0x8] sm:$0xff]  ;;  %v84_v2 = vld [vmem:[#allocation6 + $0x18] sm:$0xff]  ;;  %s777_s3 = smov [#allocation11]  }
  0x4b   :  { %177 = vmatprep.mubr.f32.mxu0 %v776_v0  ;;  %286 = vmatprep.mubr.f32.mxu1 %v776_v0  ;;  %v81_v3 = vld [vmem:[#allocation6] sm:$0xff]  ;;  %v512_v4 = vpack.c.bf16 %v84_v2, %v82_v1  ;;  %v83_v5 = vld [vmem:[#allocation6 + $0x10] sm:$0xff]  ;;  %v86_v6 = vld [vmem:[#allocation6 + $0x28] sm:$0xff]  ;;  %s456_s26 = sshll.u32 %s777_s3, 4  ;;  %s457_s26 = int_to_ptr.vmem [resolvable:$true] %s456_s26 }
  0x4c   :  { %v88_v7 = vld [vmem:[#allocation6 + $0x38] sm:$0xff]  ;;  %v514_v8 = vpack.c.bf16 %v83_v5, %v81_v3  ;;  %v85_v10 = vld [vmem:[#allocation6 + $0x20] sm:$0xff]  ;;  %v87_v11 = vld [vmem:[#allocation6 + $0x30] sm:$0xff]  ;;  %s738_s14 = scalar_lea.vmem %s457_s26, 256  ;;  %p743_p5 = scmp.lt.s32.totalorder %s457_s26, %s457_s26 }
  0x4d   :  { %v516_v9 = vpack.c.bf16 %v88_v7, %v86_v6  ;;  %v90_v12 = vld [vmem:[#allocation6 + $0x48] sm:$0xff]  ;;  %513 = vmatprep.subr.bf16.mxu0 %v512_v4  ;;  %v92_v13 = vld [vmem:[#allocation6 + $0x58] sm:$0xff]  ;;  %v518_v14 = vpack.c.bf16 %v87_v11, %v85_v10  ;;  %v89_v16 = vld [vmem:[#allocation6 + $0x40] sm:$0xff]  ;;  %p739_p4 = scmp.ne.s32.totalorder %s457_s26, %s738_s14  ;;  %p744_p6 = scmp.lt.s32.totalorder %s738_s14, %s738_s14 }
  0x4e   :  { %515 = vmatpush1.bf16.msra.mxu0 %v514_v8  ;;  %v520_v15 = vpack.c.bf16 %v92_v13, %v90_v12  ;;  %v91_v17 = vld [vmem:[#allocation6 + $0x50] sm:$0xff]  ;;  %v94_v18 = vld [vmem:[#allocation6 + $0x68] sm:$0xff]  ;;  %v96_v19 = vld [vmem:[#allocation6 + $0x78] sm:$0xff] }
  0x4f   :  { %517 = vmatprep.subr.bf16.mxu0 %v516_v9  ;;  %v522_v20 = vpack.c.bf16 %v91_v17, %v89_v16  ;;  %v93_v21 = vld [vmem:[#allocation6 + $0x60] sm:$0xff]  ;;  %v524_v22 = vpack.c.bf16 %v96_v19, %v94_v18  ;;  %v95_v23 = vld [vmem:[#allocation6 + $0x70] sm:$0xff]  ;;  %v191_v24 = vld [vmem:[#allocation8 + $0x8] sm:$0xff]  ;;  %p745_p7 = por %p744_p6, %p743_p5 }
  0x50   :  { %v193_v25 = vld [vmem:[#allocation8 + $0x18] sm:$0xff]  ;;  %v98_v26 = vld [vmem:[#allocation6 + $0x88] sm:$0xff]  ;;  %v190_v29 = vld [vmem:[#allocation8] sm:$0xff]  ;;  %v526_v32 = vpack.c.bf16 %v95_v23, %v93_v21 }
  0x51   :  { %v100_v27 = vld [vmem:[#allocation6 + $0x98] sm:$0xff]  ;;  %v544_v28 = vpack.c.bf16 %v193_v25, %v191_v24  ;;  %v97_v30 = vld [vmem:[#allocation6 + $0x80] sm:$0xff]  ;;  %v192_v31 = vld [vmem:[#allocation8 + $0x10] sm:$0xff]  ;;  %p746_p8 = pnand %p745_p7, %p739_p4 }
  0x52   :  { %519 = vmatpush1.bf16.msra.mxu0 %v518_v14  ;;  %v99_v33 = vld [vmem:[#allocation6 + $0x90] sm:$0xff]  ;;  %v546_v34 = vpack.c.bf16 %v192_v31, %v190_v29  ;;  %v195_v35 = vld [vmem:[#allocation8 + $0x28] sm:$0xff]  ;;  %v197_v36 = vld [vmem:[#allocation8 + $0x38] sm:$0xff]  ;;  %v528_v37 = vpack.c.bf16 %v100_v27, %v98_v26 }
  0x53   :  { %521 = vmatprep.subr.bf16.mxu0 %v520_v15  ;;  %545 = vmatprep.subr.bf16.mxu1 %v544_v28  ;;  %v548_v38 = vpack.c.bf16 %v197_v36, %v195_v35  ;;  %v194_v39 = vld [vmem:[#allocation8 + $0x20] sm:$0xff]  ;;  %v196_v40 = vld [vmem:[#allocation8 + $0x30] sm:$0xff]  ;;  %v199_v41 = vld [vmem:[#allocation8 + $0x48] sm:$0xff]  ;;  %v530_v49 = vpack.c.bf16 %v99_v33, %v97_v30 }
  0x54   :  { %v102_v42 = vld [vmem:[#allocation6 + $0xa8] sm:$0xff]  ;;  %v104_v43 = vld [vmem:[#allocation6 + $0xb8] sm:$0xff]  ;;  %547 = vmatpush1.bf16.msra.mxu1 %v546_v34  ;;  %v550_v44 = vpack.c.bf16 %v196_v40, %v194_v39  ;;  %v198_v47 = vld [vmem:[#allocation8 + $0x40] sm:$0xff] }
  0x55   :  { %v201_v45 = vld [vmem:[#allocation8 + $0x58] sm:$0xff]  ;;  %549 = vmatprep.subr.bf16.mxu1 %v548_v38  ;;  %v200_v48 = vld [vmem:[#allocation8 + $0x50] sm:$0xff]  ;;  %v203_v50 = vld [vmem:[#allocation8 + $0x68] sm:$0xff]  ;;  %v532_v52 = vpack.c.bf16 %v104_v43, %v102_v42 }
  0x56   :  { %523 = vmatpush1.bf16.msra.mxu0 %v522_v20  ;;  %v552_v46 = vpack.c.bf16 %v201_v45, %v199_v41  ;;  %v205_v51 = vld [vmem:[#allocation8 + $0x78] sm:$0xff]  ;;  %v101_v53 = vld [vmem:[#allocation6 + $0xa0] sm:$0xff]  ;;  %v103_v54 = vld [vmem:[#allocation6 + $0xb0] sm:$0xff]  ;;  %v554_v57 = vpack.c.bf16 %v200_v48, %v198_v47 }
  0x57   :  { %525 = vmatprep.subr.bf16.mxu0 %v524_v22  ;;  %v106_v55 = vld [vmem:[#allocation6 + $0xc8] sm:$0xff]  ;;  %v108_v56 = vld [vmem:[#allocation6 + $0xd8] sm:$0xff]  ;;  %v556_v58 = vpack.c.bf16 %v205_v51, %v203_v50  ;;  %v202_v59 = vld [vmem:[#allocation8 + $0x60] sm:$0xff]  ;;  %v534_v61 = vpack.c.bf16 %v103_v54, %v101_v53 }
  0x58   :  { %551 = vmatpush1.bf16.msra.mxu1 %v550_v44  ;;  %v204_v60 = vld [vmem:[#allocation8 + $0x70] sm:$0xff]  ;;  %v207_v62 = vld [vmem:[#allocation8 + $0x88] sm:$0xff]  ;;  %v209_v63 = vld [vmem:[#allocation8 + $0x98] sm:$0xff]  ;;  %v536_v1 = vpack.c.bf16 %v108_v56, %v106_v55 }
  0x59   :  { %553 = vmatprep.subr.bf16.mxu1 %v552_v46  ;;  %v105_v2 = vld [vmem:[#allocation6 + $0xc0] sm:$0xff]  ;;  %v107_v3 = vld [vmem:[#allocation6 + $0xd0] sm:$0xff]  ;;  %v110_v4 = vld [vmem:[#allocation6 + $0xe8] sm:$0xff]  ;;  %v558_v6 = vpack.c.bf16 %v204_v60, %v202_v59  ;;  %v560_v7 = vpack.c.bf16 %v209_v63, %v207_v62 }
  0x5a   :  { %527 = vmatpush1.bf16.msra.mxu0 %v526_v32  ;;  %v112_v5 = vld [vmem:[#allocation6 + $0xf8] sm:$0xff]  ;;  %v206_v8 = vld [vmem:[#allocation8 + $0x80] sm:$0xff]  ;;  %v208_v9 = vld [vmem:[#allocation8 + $0x90] sm:$0xff]  ;;  %v538_v10 = vpack.c.bf16 %v107_v3, %v105_v2 }
  0x5b   :  { %529 = vmatprep.subr.bf16.mxu0 %v528_v37  ;;  %v211_v11 = vld [vmem:[#allocation8 + $0xa8] sm:$0xff]  ;;  %v213_v12 = vld [vmem:[#allocation8 + $0xb8] sm:$0xff]  ;;  %v540_v13 = vpack.c.bf16 %v112_v5, %v110_v4  ;;  %v109_v14 = vld [vmem:[#allocation6 + $0xe0] sm:$0xff]  ;;  %v562_v16 = vpack.c.bf16 %v208_v9, %v206_v8 }
  0x5c   :  { %555 = vmatpush1.bf16.msra.mxu1 %v554_v57  ;;  %v111_v15 = vld [vmem:[#allocation6 + $0xf0] sm:$0xff]  ;;  %v564_v17 = vpack.c.bf16 %v213_v12, %v211_v11  ;;  %v210_v18 = vld [vmem:[#allocation8 + $0xa0] sm:$0xff]  ;;  %v215_v21 = vld [vmem:[#allocation8 + $0xc8] sm:$0xff] }
  0x5d   :  { %557 = vmatprep.subr.bf16.mxu1 %v556_v58  ;;  %v212_v19 = vld [vmem:[#allocation8 + $0xb0] sm:$0xff]  ;;  %v542_v20 = vpack.c.bf16 %v111_v15, %v109_v14  ;;  %v217_v22 = vld [vmem:[#allocation8 + $0xd8] sm:$0xff]  ;;  %v214_v25 = vld [vmem:[#allocation8 + $0xc0] sm:$0xff] }
  0x5e   :  { %531 = vmatpush1.bf16.msra.mxu0 %v530_v49  ;;  %v566_v23 = vpack.c.bf16 %v212_v19, %v210_v18  ;;  %v568_v24 = vpack.c.bf16 %v217_v22, %v215_v21  ;;  %v216_v26 = vld [vmem:[#allocation8 + $0xd0] sm:$0xff]  ;;  %v219_v28 = vld [vmem:[#allocation8 + $0xe8] sm:$0xff]  ;;  %v221_v29 = vld [vmem:[#allocation8 + $0xf8] sm:$0xff] }
  0x5f   :  { %533 = vmatprep.subr.bf16.mxu0 %v532_v52  ;;  %v79_v27 = vld [vmem:[#allocation3] sm:$0xff]  ;;  %v570_v30 = vpack.c.bf16 %v216_v26, %v214_v25  ;;  %v572_v31 = vpack.c.bf16 %v221_v29, %v219_v28  ;;  %v218_v32 = vld [vmem:[#allocation8 + $0xe0] sm:$0xff]  ;;  %v80_v34 = vld [vmem:[#allocation3 + $0x8] sm:$0xff] }
  0x60   :  { %559 = vmatpush1.bf16.msra.mxu1 %v558_v6  ;;  %v220_v33 = vld [vmem:[#allocation8 + $0xf0] sm:$0xff]  ;;  %v349_v36 = vld [vmem:[#allocation9 + $0x80] sm:$0xff]  ;;  %v350_v37 = vld [vmem:[#allocation9 + $0x88] sm:$0xff] }
  0x61   :  { %561 = vmatprep.subr.bf16.mxu1 %v560_v7  ;;  %v574_v35 = vpack.c.bf16 %v220_v33, %v218_v32  ;;  %v576_v38 = vpack.c.bf16 %v350_v37, %v349_v36  ;;  %v333_v39 = vld [vmem:[#allocation9] sm:$0xff]  ;;  %v334_v40 = vld [vmem:[#allocation9 + $0x8] sm:$0xff]  ;;  %v351_v42 = vld [vmem:[#allocation9 + $0x90] sm:$0xff] }
  0x62   :  { %535 = vmatpush1.bf16.msra.mxu0 %v534_v61  ;;  %v578_v41 = vpack.c.bf16 %v334_v40, %v333_v39  ;;  %v352_v43 = vld [vmem:[#allocation9 + $0x98] sm:$0xff]  ;;  %v335_v45 = vld [vmem:[#allocation9 + $0x10] sm:$0xff]  ;;  %v354_v48 = vld [vmem:[#allocation9 + $0xa8] sm:$0xff] }
  0x63   :  { %537 = vmatprep.subr.bf16.mxu0 %v536_v1  ;;  %v580_v44 = vpack.c.bf16 %v352_v43, %v351_v42  ;;  %v336_v46 = vld [vmem:[#allocation9 + $0x18] sm:$0xff]  ;;  %v337_v50 = vld [vmem:[#allocation9 + $0x20] sm:$0xff]  ;;  %v338_v51 = vld [vmem:[#allocation9 + $0x28] sm:$0xff] }
  0x64   :  { %563 = vmatpush1.bf16.msra.mxu1 %v562_v16  ;;  %v582_v47 = vpack.c.bf16 %v336_v46, %v335_v45  ;;  %v586_v52 = vpack.c.bf16 %v338_v51, %v337_v50  ;;  %v355_v53 = vld [vmem:[#allocation9 + $0xb0] sm:$0xff]  ;;  %v356_v54 = vld [vmem:[#allocation9 + $0xb8] sm:$0xff]  ;;  %v357_v59 = vld [vmem:[#allocation9 + $0xc0] sm:$0xff] }
  0x65   :  { %565 = vmatprep.subr.bf16.mxu1 %v564_v17  ;;  %v588_v55 = vpack.c.bf16 %v356_v54, %v355_v53  ;;  %v339_v56 = vld [vmem:[#allocation9 + $0x30] sm:$0xff]  ;;  %v340_v57 = vld [vmem:[#allocation9 + $0x38] sm:$0xff]  ;;  %v358_v60 = vld [vmem:[#allocation9 + $0xc8] sm:$0xff] }
  0x66   :  { %539 = vmatpush1.bf16.msra.mxu0 %v538_v10  ;;  %v590_v58 = vpack.c.bf16 %v340_v57, %v339_v56  ;;  %v592_v61 = vpack.c.bf16 %v358_v60, %v357_v59  ;;  %v341_v62 = vld [vmem:[#allocation9 + $0x40] sm:$0xff]  ;;  %v342_v63 = vld [vmem:[#allocation9 + $0x48] sm:$0xff]  ;;  %v359_v2 = vld [vmem:[#allocation9 + $0xd0] sm:$0xff] }
  0x67   :  { %541 = vmatprep.subr.bf16.mxu0 %v540_v13  ;;  %v594_v1 = vpack.c.bf16 %v342_v63, %v341_v62  ;;  %v360_v3 = vld [vmem:[#allocation9 + $0xd8] sm:$0xff]  ;;  %v343_v5 = vld [vmem:[#allocation9 + $0x50] sm:$0xff]  ;;  %v361_v8 = vld [vmem:[#allocation9 + $0xe0] sm:$0xff] }
  0x68   :  { %567 = vmatpush1.bf16.msra.mxu1 %v566_v23  ;;  %v596_v4 = vpack.c.bf16 %v360_v3, %v359_v2  ;;  %v344_v6 = vld [vmem:[#allocation9 + $0x58] sm:$0xff]  ;;  %v362_v9 = vld [vmem:[#allocation9 + $0xe8] sm:$0xff]  ;;  %v345_v11 = vld [vmem:[#allocation9 + $0x60] sm:$0xff] }
  0x69   :  { %569 = vmatprep.subr.bf16.mxu1 %v568_v24  ;;  %v598_v7 = vpack.c.bf16 %v344_v6, %v343_v5  ;;  %v600_v10 = vpack.c.bf16 %v362_v9, %v361_v8  ;;  %v346_v12 = vld [vmem:[#allocation9 + $0x68] sm:$0xff]  ;;  %v363_v14 = vld [vmem:[#allocation9 + $0xf0] sm:$0xff]  ;;  %v364_v15 = vld [vmem:[#allocation9 + $0xf8] sm:$0xff] }
  0x6a   :  { %543 = vmatpush1.bf16.msra.mxu0 %v542_v20  ;;  %v602_v13 = vpack.c.bf16 %v346_v12, %v345_v11  ;;  %v604_v16 = vpack.c.bf16 %v364_v15, %v363_v14  ;;  %v347_v17 = vld [vmem:[#allocation9 + $0x70] sm:$0xff]  ;;  %v348_v18 = vld [vmem:[#allocation9 + $0x78] sm:$0xff] }
  0x6b   :  { %577 = vmatprep.subr.bf16.mxu0 %v576_v38  ;;  %v606_v19 = vpack.c.bf16 %v348_v18, %v347_v17 }
  0x6c   :  { %571 = vmatpush1.bf16.msra.mxu1 %v570_v30 }
  0x6d   :  { %178 = vmatmul.mubr.f32.vlgmr.msra.gmra.mrb[0].mxu0 %v79_v27  ;;  %573 = vmatprep.subr.bf16.mxu1 %v572_v31 }
  0x6e   :  { %183 = vmatprep.mubr.f32.mxu0 %v776_v0  ;;  %579 = vmatpush3.bf16.msra.mxu0 %v578_v41 }
  0x6f   :  { %581 = vmatprep.subr.bf16.mxu0 %v580_v44 }
  0x70   :  { %575 = vmatpush1.bf16.msra.mxu1 %v574_v35 }
  0x71   :  { %184 = vmatmul.mubr.f32.gmra.mrb[2].mxu0 %v80_v34  ;;  %608 = vmatprep.subr.bf16.mxu1 %v576_v38 }
  0x72   :  { %583 = vmatpush3.bf16.msra.mxu0 %v582_v47 }
  0x73   :  { %287 = vmatmul.mubr.f32.vlgmr.msra.gmra.mrb[0].mxu1 %v79_v27 }
  0x74   :  { %292 = vmatprep.mubr.f32.mxu1 %v776_v0  ;;  %616 = vmatpush3.bf16.msra.mxu1 %v578_v41  ;;  %v353_v0 = vld [vmem:[#allocation9 + $0xa0] sm:$0xff] }
  0x75   :  { %609 = vmatprep.subr.bf16.mxu1 %v580_v44  ;;  %v584_v49 = vpack.c.bf16 %v354_v48, %v353_v0 }
  0x77   :  { %293 = vmatmul.mubr.f32.gmra.mrb[2].mxu1 %v80_v34  ;;  %585 = vmatprep.subr.bf16.mxu0 %v584_v49 }
  0x78   :  { %617 = vmatpush3.bf16.msra.mxu1 %v582_v47  ;;  %587 = vmatpush3.bf16.msra.mxu0 %v586_v52 }
  0x79   :  { %610 = vmatprep.subr.bf16.mxu1 %v584_v49  ;;  %589 = vmatprep.subr.bf16.mxu0 %v588_v55 }
  0x7c   :  { %618 = vmatpush3.bf16.msra.mxu1 %v586_v52  ;;  %591 = vmatpush3.bf16.msra.mxu0 %v590_v58 }
  0x7d   :  { %611 = vmatprep.subr.bf16.mxu1 %v588_v55  ;;  %593 = vmatprep.subr.bf16.mxu0 %v592_v61 }
  0x80   :  { %619 = vmatpush3.bf16.msra.mxu1 %v590_v58  ;;  %595 = vmatpush3.bf16.msra.mxu0 %v594_v1 }
  0x81   :  { %612 = vmatprep.subr.bf16.mxu1 %v592_v61  ;;  %597 = vmatprep.subr.bf16.mxu0 %v596_v4 }
  0x84   :  { %620 = vmatpush3.bf16.msra.mxu1 %v594_v1  ;;  %599 = vmatpush3.bf16.msra.mxu0 %v598_v7 }
  0x85   :  { %613 = vmatprep.subr.bf16.mxu1 %v596_v4  ;;  %601 = vmatprep.subr.bf16.mxu0 %v600_v10 }
  0x88   :  { %621 = vmatpush3.bf16.msra.mxu1 %v598_v7  ;;  %603 = vmatpush3.bf16.msra.mxu0 %v602_v13 }
  0x89   :  { %614 = vmatprep.subr.bf16.mxu1 %v600_v10  ;;  %605 = vmatprep.subr.bf16.mxu0 %v604_v16 }
  0x8c   :  { %622 = vmatpush3.bf16.msra.mxu1 %v602_v13  ;;  %607 = vmatpush3.bf16.msra.mxu0 %v606_v19 }
  0x8d   :  { %615 = vmatprep.subr.bf16.mxu1 %v604_v16 }
  0x90   :  { %623 = vmatpush3.bf16.msra.mxu1 %v606_v19 }
 0x140   :  { %v179_v20 = vpop.f32.mrb[0].mxu0 }
 0x141   :  { %v470_v21 = vmul.f32 -1.442695, %v179_v20  ;;  %v181_v22 = vpop.f32.mrb[1].mxu0 }
 0x142   :  { %v471_v23 = vmul.f32 -1.442695, %v181_v22 }
 0x143   :  { %634 = vpow2.f32 %v470_v21 }
 0x144   :  { %636 = vpow2.f32 %v471_v23  ;;  %v185_v24 = vpop.f32.mrb[2].mxu0 }
 0x145   :  { %v472_v25 = vmul.f32 -1.442695, %v185_v24  ;;  %v187_v26 = vpop.f32.mrb[3].mxu0 }
 0x146   :  { %v473_v27 = vmul.f32 -1.442695, %v187_v26  ;;  %v288_v28 = vpop.f32.mrb[0].mxu1 }
 0x147   :  { %638 = vpow2.f32 %v472_v25  ;;  %v290_v29 = vpop.f32.mrb[1].mxu1 }
 0x148   :  { %640 = vpow2.f32 %v473_v27 }
 0x14a   :  { %v294_v33 = vpop.f32.mrb[2].mxu1 }
 0x14b   :  { %v296_v35 = vpop.f32.mrb[3].mxu1 }
 0x14d   :  { %v635_v30 = vpop.eup %634 }
 0x14e   :  { %v637_v31 = vpop.eup %636  ;;  %v311_v32 = vadd.f32 1.0, %v635_v30 }
 0x14f   :  { %v312_v34 = vadd.f32 1.0, %v637_v31 }
 0x150   :  { %642 = vrcp.f32 %v311_v32 }
 0x151   :  { %v639_v36 = vpop.eup %638  ;;  %644 = vrcp.f32 %v312_v34 }
 0x152   :  { %v641_v37 = vpop.eup %640  ;;  %v313_v38 = vadd.f32 1.0, %v639_v36 }
 0x153   :  { %v314_v39 = vadd.f32 1.0, %v641_v37 }
 0x154   :  { %646 = vrcp.f32 %v313_v38 }
 0x155   :  { %648 = vrcp.f32 %v314_v39 }
 0x15a   :  { %v643_v40 = vpop.eup %642 }
 0x15b   :  { %v645_v41 = vpop.eup %644  ;;  %v323_v42 = vmul.f32 %v643_v40, %v179_v20 }
 0x15c   :  { %v324_v43 = vmul.f32 %v645_v41, %v181_v22 }
 0x15d   :  { %v327_v44 = vmul.f32 %v323_v42, %v288_v28 }
 0x15e   :  { %v647_v45 = vpop.eup %646  ;;  %v328_v46 = vmul.f32 %v324_v43, %v290_v29 }
 0x15f   :  { %v649_v47 = vpop.eup %648  ;;  %v325_v0 = vmul.f32 %v647_v45, %v185_v24 }
 0x160   :  { %v326_v48 = vmul.f32 %v649_v47, %v187_v26  ;;  %429 = vmatprep.mubr.f32.mxu0 %v328_v46 }
 0x161   :  { %v329_v49 = vmul.f32 %v325_v0, %v294_v33  ;;  %430 = vmatmul.mubr.f32.vlgmr.msra.gmra.mrb[4].mxu0 %v327_v44 }
 0x162   :  { %v330_v50 = vmul.f32 %v326_v48, %v296_v35 }
 0x164   :  { %434 = vmatprep.mubr.f32.mxu1 %v330_v50 }
 0x165   :  { %435 = vmatmul.mubr.f32.vlgmr.msra.gmra.mrb[4].mxu1 %v329_v49 }
 0x234   :  { %v506_v51 = vpop.f32.mrb[4].mxu0 }
 0x235   :  { %v507_v52 = vpop.f32.mrb[5].mxu0 }
 0x236   :  { %v508_v53 = vadd.f32 %v507_v52, %v506_v51 }
 0x238   :  { %449 = vst [vmem:[#allocation11] sm:$0xff] %v508_v53  ;;  %v509_v54 = vpop.f32.mrb[4].mxu1 }
 0x239   :  { %v510_v55 = vpop.f32.mrb[5].mxu1 }
 0x23a   :  { %v511_v56 = vadd.f32 %v510_v55, %v509_v54 }
 0x23c   :  { %450 = vst [vmem:[#allocation11 + $0x8] sm:$0xff] %v511_v56 }
 0x23d   :  { %749 = shalt.err (!%p746_p8)
}
 0x23e   :  { %s750_s17 = scalar_lea.hbm %s893_s4, 256 }
 0x23f   :  { %p751_p9 = scmp.ne.s32.totalorder %s893_s4, %s750_s17  ;;  %p754_p10 = scmp.lt.u32.totalorder %s750_s17, %s893_s4 }
 0x241   :  { %p756_p11 = pnand %p754_p10, %p751_p9 }
 0x243   :  { %759 = shalt.err (!%p756_p11)
}
 0x244   :  { %462 = dma.vmem_to_hbm [thread:$0]  %s457_s26, 256, %s893_s4, [#allocation5], %s772_s1, %s772_s1, %s773_s13  }
 0x245   :  { %766 = dma.done.wait [#allocation5], 256  }
 0x246   :  { %767 = vsyncadd [#allocation5], 4294967040 }
 0x247   :  { %466 = vsyncpa [#allocation4], 1 }
 0x248   :  { %467 = vsyncpa [#allocation7], 1 }
 0x249   :  { %468 = vsyncpa [#allocation10], 1 }
 0x24a   :  { %469 = vsyncpa [#allocation5], 1 }

</bundles_post_ra>
